<compile_context>
chip_gen: v7x
topology: tpu7x:2x2x1
jax: 0.10.0
libtpu: 0.0.40
codegen_flags: <defaults>
</compile_context>

<pallas_src>
import functools
import math

import jax
import jax.numpy as jnp
from jax.experimental import pallas as pl
from jax.experimental.pallas import tpu as pltpu

_LANE = 128


def _round_up(x, m):
    return (x + m - 1) // m * m


def _apply_nonlinearity(x, nonlinearity):
    if nonlinearity == "tanh":
        return jnp.tanh(x)
    elif nonlinearity == "relu":
        return jnp.maximum(x, jnp.zeros_like(x))
    else:
        raise ValueError(f"unsupported nonlinearity: {nonlinearity}")


def _rnn_step_fused_kernel(x_ref, h_ref, w_ref, o_ref, xh_ref, *,
                           input_dim, hidden_dim, nonlinearity):
    # x_ref:  (B, D_in)            VMEM
    # h_ref:  (B, H)               VMEM
    # w_ref:  (D_in + H, H_pad)    VMEM   fused [Wi; Wh]^T, lane-padded
    # o_ref:  (B, H_pad)           VMEM   lane-dense output
    # xh_ref: (B, D_in + H)        VMEM scratch for the fused contraction operand
    #
    # Assemble [x | h] in VMEM (two cheap masked stores within one vreg),
    # then a single MXU matmul over the fused K axis.
    xh_ref[:, :input_dim] = x_ref[...]
    xh_ref[:, input_dim:input_dim + hidden_dim] = h_ref[...]
    acc = jnp.dot(xh_ref[...], w_ref[...], preferred_element_type=jnp.float32)
    o_ref[...] = _apply_nonlinearity(acc, nonlinearity).astype(o_ref.dtype)


def _rnn_step_x_only_kernel(x_ref, w_ref, o_ref, *, nonlinearity):
    # hidden_state is None -> h contribution is exactly zero; skip it entirely.
    acc = jnp.dot(x_ref[...], w_ref[...], preferred_element_type=jnp.float32)
    o_ref[...] = _apply_nonlinearity(acc, nonlinearity).astype(o_ref.dtype)


def prepare_rnn_weights(input_weights, hidden_weights):
    """One-time weight prep (call at parameter-init time, NOT per step).

    input_weights:  (hidden_dim, input_dim)   PyTorch layout
    hidden_weights: (hidden_dim, hidden_dim)

    Returns:
      w_xh: (input_dim + hidden_dim, hidden_pad)  fused [Wi | Wh]^T, zero-padded
            along the output/lane dim to a multiple of 128.
      w_x:  (input_dim, hidden_pad)               the Wi^T rows only, for the
            hidden_state=None fast path.
    """
    hidden_dim, input_dim = input_weights.shape
    hidden_pad = _round_up(hidden_dim, _LANE)
    w_fused = jnp.concatenate([input_weights, hidden_weights], axis=1)  # (H, K)
    w_xh = w_fused.T                                                    # (K, H)
    if hidden_pad != hidden_dim:
        w_xh = jnp.pad(w_xh, ((0, 0), (0, hidden_pad - hidden_dim)))
    w_x = w_xh[:input_dim]
    return w_xh, w_x


def rnn_layer_forward(features, prepared_weights, hidden_state=None,
                      nonlinearity="tanh"):
    """Pallas equivalent of RNNLayer.forward.

    features:         (batch, input_dim)
    prepared_weights: output of prepare_rnn_weights(input_weights, hidden_weights)
    hidden_state:     (batch, hidden_dim) or None
    """
    if nonlinearity not in ("tanh", "relu"):
        raise ValueError(f"unsupported nonlinearity: {nonlinearity}")

    w_xh, w_x = prepared_weights
    batch, input_dim = features.shape
    k_total, hidden_pad = w_xh.shape
    hidden_dim = k_total - input_dim

    vmem = pl.BlockSpec(memory_space=pltpu.MemorySpace.VMEM)
    out_shape = jax.ShapeDtypeStruct((batch, hidden_pad), features.dtype)

    if hidden_state is None:
        out = pl.pallas_call(
            functools.partial(_rnn_step_x_only_kernel, nonlinearity=nonlinearity),
            out_shape=out_shape,
            in_specs=[vmem, vmem],
            out_specs=vmem,
        )(features, w_x)
    else:
        out = pl.pallas_call(
            functools.partial(_rnn_step_fused_kernel,
                              input_dim=input_dim, hidden_dim=hidden_dim,
                              nonlinearity=nonlinearity),
            out_shape=out_shape,
            in_specs=[vmem, vmem, vmem],
            out_specs=vmem,
            scratch_shapes=[pltpu.VMEM((batch, k_total), features.dtype)],
        )(features, hidden_state, w_xh)

    if hidden_pad != hidden_dim:
        out = out[:, :hidden_dim]
    return out

    # TODO(synk): if this cell is driven over a time sequence, move the time
    # loop inside a single pallas_call (grid over timesteps, weights
    # VMEM-resident, h kept in VMEM scratch) instead of one call per step.


def init_rnn_params(key, input_dim, hidden_dim, dtype=jnp.float32):
    """Deterministic init mirroring RNNLayer.init_weights: U(-K, K), K = 1/sqrt(hidden_dim)."""
    K = 1.0 / math.sqrt(hidden_dim)
    k_in, k_h = jax.random.split(key)
    input_weights = jax.random.uniform(k_in, (hidden_dim, input_dim),
                                       minval=-K, maxval=K, dtype=dtype)
    hidden_weights = jax.random.uniform(k_h, (hidden_dim, hidden_dim),
                                        minval=-K, maxval=K, dtype=dtype)
    return input_weights, hidden_weights


if __name__ == "__main__":
    key = jax.random.PRNGKey(0)
    k_params, k_x, k_h = jax.random.split(key, 3)

    batch, input_dim, hidden_dim = 8, 16, 32

    input_weights, hidden_weights = init_rnn_params(k_params, input_dim, hidden_dim)
    prepared = prepare_rnn_weights(input_weights, hidden_weights)   # one-time prep

    features = jax.random.normal(k_x, (batch, input_dim), dtype=jnp.float32)
    hidden_state = jax.random.normal(k_h, (batch, hidden_dim), dtype=jnp.float32)

    # Hidden-state path (fused single matmul).
    out = rnn_layer_forward(features, prepared, hidden_state)
    out = jax.block_until_ready(out)

    # hidden_state=None fast path (x-only kernel).
    out_no_h = rnn_layer_forward(features, prepared, None)
    out_no_h = jax.block_until_ready(out_no_h)

    # relu variant (matches the module's nonlinearity dictionary).
    out_relu = rnn_layer_forward(features, prepared, hidden_state, nonlinearity="relu")
    out_relu = jax.block_until_ready(out_relu)

    # Pure-JAX reference checks.
    pre = features @ input_weights.T + hidden_state @ hidden_weights.T
    ref = jnp.tanh(pre)
    assert out.shape == (batch, hidden_dim)
    assert jnp.allclose(out, ref, atol=1e-5, rtol=1e-5)

    ref_no_h = jnp.tanh(features @ input_weights.T)
    assert out_no_h.shape == (batch, hidden_dim)
    assert jnp.allclose(out_no_h, ref_no_h, atol=1e-5, rtol=1e-5)

    ref_relu = jnp.maximum(pre, 0.0)
    assert jnp.allclose(out_relu, ref_relu, atol=1e-5, rtol=1e-5)

    print("KERNEL_OK")
</pallas_src>

<mosaic_0001>
module attributes {stable_mosaic.version = 11 : i64} {
  func.func @_rnn_step_fused_kernel(%arg0: memref<8x16xf32, #tpu.memory_space<vmem>>, %arg1: memref<8x32xf32, #tpu.memory_space<vmem>>, %arg2: memref<48x128xf32, #tpu.memory_space<vmem>>, %arg3: memref<8x128xf32, #tpu.memory_space<vmem>>, %arg4: memref<8x48xf32, #tpu.memory_space<vmem>>) attributes {dimension_semantics = [], scalar_prefetch = 0 : i64, scratch_operands = 1 : i64, tpu.core_type = #tpu.core_type<tc>} {
    %c0 = arith.constant 0 : index
    %c0_0 = arith.constant 0 : index
    %0 = vector.load %arg0[%c0, %c0_0] : memref<8x16xf32, #tpu.memory_space<vmem>>, vector<8x16xf32>
    %c0_1 = arith.constant 0 : index
    %c0_2 = arith.constant 0 : index
    %1 = vector.load %arg4[%c0_1, %c0_2] : memref<8x48xf32, #tpu.memory_space<vmem>>, vector<8x16xf32>
    tpu.vector_store %arg4[%c0_1, %c0_2], %0 {strides = array<i32>} : memref<8x48xf32, #tpu.memory_space<vmem>>, vector<8x16xf32>,
    %c0_3 = arith.constant 0 : index
    %c0_4 = arith.constant 0 : index
    %2 = vector.load %arg1[%c0_3, %c0_4] : memref<8x32xf32, #tpu.memory_space<vmem>>, vector<8x32xf32>
    %c0_5 = arith.constant 0 : index
    %c16 = arith.constant 16 : index
    %3 = vector.load %arg4[%c0_5, %c16] : memref<8x48xf32, #tpu.memory_space<vmem>>, vector<8x32xf32>
    tpu.vector_store %arg4[%c0_5, %c16], %2 {strides = array<i32>} : memref<8x48xf32, #tpu.memory_space<vmem>>, vector<8x32xf32>,
    %c0_6 = arith.constant 0 : index
    %c0_7 = arith.constant 0 : index
    %4 = vector.load %arg4[%c0_6, %c0_7] : memref<8x48xf32, #tpu.memory_space<vmem>>, vector<8x48xf32>
    %c0_8 = arith.constant 0 : index
    %c0_9 = arith.constant 0 : index
    %5 = vector.load %arg2[%c0_8, %c0_9] : memref<48x128xf32, #tpu.memory_space<vmem>>, vector<48x128xf32>
    %cst = arith.constant dense<0.000000e+00> : vector<8x128xf32>
    %6 = tpu.matmul %4, %5, %cst {dimension_numbers = #tpu.dot_dimension_numbers<[1], [0], [0], [1], [0, 0, 1, 1], [], []>} : vector<8x48xf32>, vector<48x128xf32>, vector<8x128xf32> -> vector<8x128xf32>
    %7 = math.tanh %6 : vector<8x128xf32>
    %c0_10 = arith.constant 0 : index
    %c0_11 = arith.constant 0 : index
    %8 = vector.load %arg3[%c0_10, %c0_11] : memref<8x128xf32, #tpu.memory_space<vmem>>, vector<8x128xf32>
    tpu.vector_store %arg3[%c0_10, %c0_11], %7 {strides = array<i32>} : memref<8x128xf32, #tpu.memory_space<vmem>>, vector<8x128xf32>,
    return
  }
}

</mosaic_0001>

<bundles_post_ra>
// kernel: tpu_custom_call.1
= control target key start
LH: loop header
LB: loop body
LE: loop exit
PB: predicated region body
PF: predicated region fallthrough
CT: control target
= control target key end

     0   :  { %8 = vsyncpa [#allocation4], 0  ;;  %s377_s0 = inlined_call_operand.hbm [shape: f32[8,16], index: 0, kind: input, shape index: {}]   ;;  %s378_s1 = inlined_call_operand.hbm [shape: f32[8,32], index: 1, kind: input, shape index: {}]   ;;  %s379_s2 = inlined_call_operand.hbm [shape: f32[48,128], index: 2, kind: input, shape index: {}]   ;;  %s380_s3 = inlined_call_operand.hbm [shape: f32[8,128], index: 3, kind: output, shape index: {}]  }
   0x1   :  { %9 = vsyncpa [#allocation7], 0 }
   0x2   :  { %10 = vsyncpa [#allocation5], 0  ;;  %s299_s12 = smov [#allocation6]   ;;  %s300_s14 = smov [#allocation3]  }
   0x3   :  { %s27_s13 = sshll.u32 %s299_s12, 4  ;;  %s17_s15 = sshll.u32 %s300_s14, 4  ;;  %s28_s13 = int_to_ptr.vmem [resolvable:$true] %s27_s13  ;;  %s18_s15 = int_to_ptr.vmem [resolvable:$true] %s17_s15 }
   0x4   :  { %s205_s18 = scalar_lea.hbm %s378_s1, 128 }
   0x5   :  { %p206_p0 = scmp.ne.s32.totalorder %s378_s1, %s205_s18  ;;  %p209_p1 = scmp.lt.u32.totalorder %s205_s18, %s378_s1 }
   0x7   :  { %p211_p2 = pnand %p209_p1, %p206_p0 }
   0x9   :  { %214 = shalt.err (!%p211_p2)
}
   0xa   :  { %s215_s23 = scalar_lea.vmem %s28_s13, 128  ;;  %p220_p4 = scmp.lt.s32.totalorder %s28_s13, %s28_s13 }
   0xb   :  { %p216_p3 = scmp.ne.s32.totalorder %s28_s13, %s215_s23  ;;  %p221_p5 = scmp.lt.s32.totalorder %s215_s23, %s215_s23 }
   0xd   :  { %p222_p6 = por %p221_p5, %p220_p4 }
   0xf   :  { %p223_p7 = pnand %p222_p6, %p216_p3 }
  0x11   :  { %226 = shalt.err (!%p223_p7)
}
  0x12   :  { %30 = dma.hbm_to_vmem [thread:$0]  %s378_s1, 128, %s28_s13, [#allocation7]  }
  0x13   :  { %s227_s28 = scalar_lea.hbm %s377_s0, 128 }
  0x14   :  { %p228_p8 = scmp.ne.s32.totalorder %s377_s0, %s227_s28  ;;  %p231_p9 = scmp.lt.u32.totalorder %s227_s28, %s377_s0 }
  0x16   :  { %p233_p10 = pnand %p231_p9, %p228_p8 }
  0x18   :  { %236 = shalt.err (!%p233_p10)
}
  0x19   :  { %s237_s6 = scalar_lea.vmem %s18_s15, 128  ;;  %p242_p12 = scmp.lt.s32.totalorder %s18_s15, %s18_s15 }
  0x1a   :  { %p238_p11 = scmp.ne.s32.totalorder %s18_s15, %s237_s6  ;;  %p243_p13 = scmp.lt.s32.totalorder %s237_s6, %s237_s6 }
  0x1c   :  { %p244_p0 = por %p243_p13, %p242_p12 }
  0x1e   :  { %p245_p1 = pnand %p244_p0, %p238_p11 }
  0x20   :  { %248 = shalt.err (!%p245_p1)
}
  0x21   :  { %20 = dma.hbm_to_vmem [thread:$0]  %s377_s0, 128, %s18_s15, [#allocation4]  }
  0x22   :  { %s301_s8 = smov [#allocation8]   ;;  %s249_s12 = scalar_lea.hbm %s379_s2, 768 }
  0x23   :  { %s36_s9 = sshll.u32 %s301_s8, 4  ;;  %p250_p2 = scmp.ne.s32.totalorder %s379_s2, %s249_s12  ;;  %s37_s9 = int_to_ptr.vmem [resolvable:$true] %s36_s9 }
  0x24   :  { %p253_p3 = scmp.lt.u32.totalorder %s249_s12, %s379_s2 }
  0x26   :  { %p255_p4 = pnand %p253_p3, %p250_p2 }
  0x28   :  { %258 = shalt.err (!%p255_p4)
}
  0x29   :  { %s259_s18 = scalar_lea.vmem %s37_s9, 768  ;;  %p264_p6 = scmp.lt.s32.totalorder %s37_s9, %s37_s9 }
  0x2a   :  { %p260_p5 = scmp.ne.s32.totalorder %s37_s9, %s259_s18  ;;  %p265_p7 = scmp.lt.s32.totalorder %s259_s18, %s259_s18 }
  0x2c   :  { %p266_p8 = por %p265_p7, %p264_p6 }
  0x2e   :  { %p267_p9 = pnand %p266_p8, %p260_p5 }
  0x30   :  { %270 = shalt.err (!%p267_p9)
}
  0x31   :  { %s302_s0 = smov 128   ;;  %s303_s15 = smov 8  }
  0x32   :  { %42 = dma.hbm_to_vmem [thread:$0]  %s379_s2, 768, %s37_s9, [#allocation7], %s302_s0, %s302_s0, %s303_s15  }
  0x33   :  { %293 = dma.done.wait [#allocation4], 128  }
  0x34   :  { %294 = vsyncadd [#allocation4], 4294967168 }
  0x35   :  { %295 = dma.done.wait [#allocation7], 896  }
  0x36   :  { %296 = vsyncadd [#allocation7], 4294966400  ;;  %v304_v0 = vmov 0.0|0.0   ;;  %vm305_vm0 = vmmov 0   ;;  %v306_v1 = vmov 0.0   ;;  %vm53_vm1 = vcmask 130048  }
  0x37   :  { %184 = vmatprep.subr.bf16.mxu0 %v304_v0  ;;  %181 = vmatprep.mubr.msk.f32.mxu0 %vm305_vm0, %v306_v1  ;;  %v55_v2 = vld [vmem:[#allocation6] sm:$0xff]  ;;  %v63_v3 = vld [vmem:[#allocation8] sm:$0xff]  ;;  %v64_v4 = vld [vmem:[#allocation8 + $0x8] sm:$0xff]  ;;  %s307_s21 = smov 16   ;;  %vm60_vm2 = vcmask 392320   ;;  %vm69_vm3 = vcmask 392192  }
  0x38   :  { %57 = vrot.lane.b32.xlu0 %v55_v2, %s307_s21  ;;  %v185_v5 = vpack.c.bf16 %v64_v4, %v63_v3  ;;  %v52_v6 = vld [vmem:[#allocation3] sm:$0xff]  ;;  %v66_v8 = vld [vmem:[#allocation8 + $0x18] sm:$0xff]  ;;  %v67_v10 = vld [vmem:[#allocation8 + $0x20] sm:$0xff]  ;;  %s308_s2 = smov [#allocation9]  }
  0x39   :  { %v65_v7 = vld [vmem:[#allocation8 + $0x10] sm:$0xff]  ;;  %54 = vst.msk [vmem:[#allocation2] sm:$0xff] %vm53_vm1, %v52_v6  ;;  %v68_v11 = vld [vmem:[#allocation8 + $0x28] sm:$0xff]  ;;  %s151_s22 = sshll.u32 %s308_s2, 4  ;;  %s152_s22 = int_to_ptr.vmem [resolvable:$true] %s151_s22 }
  0x3a   :  { %186 = vmatpush3.bf16.msra.mxu0 %v185_v5  ;;  %v188_v9 = vpack.c.bf16 %v66_v8, %v65_v7  ;;  %v191_v12 = vpack.c.bf16 %v68_v11, %v67_v10  ;;  %s271_s23 = scalar_lea.vmem %s152_s22, 128  ;;  %p276_p11 = scmp.lt.s32.totalorder %s152_s22, %s152_s22 }
  0x3b   :  { %187 = vmatprep.subr.bf16.mxu0 %v304_v0  ;;  %p272_p10 = scmp.ne.s32.totalorder %s152_s22, %s271_s23  ;;  %p277_p12 = scmp.lt.s32.totalorder %s271_s23, %s271_s23 }
  0x3d   :  { %p278_p13 = por %p277_p12, %p276_p11 }
  0x3e   :  { %189 = vmatpush3.bf16.msra.mxu0 %v188_v9 }
  0x3f   :  { %190 = vmatprep.subr.bf16.mxu0 %v304_v0  ;;  %p279_p0 = pnand %p278_p13, %p272_p10 }
  0x42   :  { %192 = vmatpush3.bf16.msra.mxu0 %v191_v12 }
  0xaa   :  { %v58_v13 = vpop.permute.xlu0 %57 }
  0xab   :  { %61 = vst.msk [vmem:[#allocation2] sm:$0xff] %vm60_vm2, %v58_v13 }
  0xb2   :  { %v62_v14 = vld [vmem:[#allocation2] sm:$0xff] }
  0xb3   :  { %182 = vmatmul.mubr.msk.f32.vlgmr.msra.gmra.mrb[0].mxu0 %vm69_vm3, %v62_v14 }
 0x186   :  { %v139_v15 = vpop.f32.mrb[0].mxu0 }
 0x187   :  { %203 = vtanh.f32 %v139_v15  ;;  %v183_v16 = vpop.f32.mrb[1].mxu0 }
 0x191   :  { %v204_v17 = vpop.eup %203 }
 0x192   :  { %144 = vst [vmem:[#allocation9] sm:$0xff] %v204_v17 }
 0x193   :  { %282 = shalt.err (!%p279_p0)
}
 0x194   :  { %s283_s26 = scalar_lea.hbm %s380_s3, 128 }
 0x195   :  { %p284_p1 = scmp.ne.s32.totalorder %s380_s3, %s283_s26  ;;  %p287_p2 = scmp.lt.u32.totalorder %s283_s26, %s380_s3 }
 0x197   :  { %p289_p3 = pnand %p287_p2, %p284_p1 }
 0x199   :  { %292 = shalt.err (!%p289_p3)
}
 0x19a   :  { %154 = dma.vmem_to_hbm [thread:$0]  %s152_s22, 128, %s380_s3, [#allocation5]  }
 0x19b   :  { %297 = dma.done.wait [#allocation5], 128  }
 0x19c   :  { %298 = vsyncadd [#allocation5], 4294967168 }
 0x19d   :  { %158 = vsyncpa [#allocation4], 1 }
 0x19e   :  { %159 = vsyncpa [#allocation7], 1 }
 0x19f   :  { %160 = vsyncpa [#allocation5], 1 }

</bundles_post_ra>
